<compile_context>
chip_gen: v7x
topology: tpu7x:2x2x1
jax: 0.10.0
libtpu: 0.0.40
codegen_flags: <defaults>
</compile_context>

<pallas_src>
import math

import jax
import jax.numpy as jnp
import numpy as np
from jax import lax
from jax.experimental import pallas as pl
from jax.experimental.pallas import tpu as pltpu

EPS = 1e-5  # PyTorch BatchNorm2d default


# ----------------------------------------------------------------------------
# Wrapper-side operand construction (all compile-time numpy)
# ----------------------------------------------------------------------------
def _pad_channels(c, w):
    """Smallest channel count >= c such that w * c_pad is a multiple of 128."""
    g = 128 // math.gcd(w, 128)          # w=16 -> g=8 (power-of-two W assumed sane)
    return max(g, ((c + g - 1) // g) * g)


def _band_matrices(w9, W, cin_p, cout_p):
    """Per-dy banded conv matrices: (3, W*cin_p, W*cout_p).

    w9: (9, Cin, Cout), tap index t = dy*3 + dx.  Row = w_in*cin_p + ci,
    col = w_out*cout_p + co; dx shift and the W zero-padding are baked in.
    Padded channels get zero weights.
    """
    w9 = np.asarray(w9, np.float32)
    _, cin, cout = w9.shape
    w9p = np.zeros((9, cin_p, cout_p), np.float32)
    w9p[:, :cin, :cout] = w9
    bands = np.zeros((3, W * cin_p, W * cout_p), np.float32)
    for dy in range(3):
        for dx in range(3):
            # sel[w_in, w_out] = 1 iff w_in == w_out + dx - 1 (in range)
            sel = np.eye(W, k=1 - dx, dtype=np.float32)
            bands[dy] += np.kron(sel, w9p[dy * 3 + dx])
    return jnp.asarray(bands)


def _bn_mats(W, c_p, nhw):
    """pool: (W*c_p, c_p) pre-scaled by 1/(N*H*W);  bcast: (c_p, W*c_p)."""
    eye = np.eye(c_p, dtype=np.float32)
    pool = np.kron(np.ones((W, 1), np.float32), eye) * np.float32(1.0 / nhw)
    bcast = np.kron(np.ones((1, W), np.float32), eye)
    return jnp.asarray(pool), jnp.asarray(bcast)


def _pack_gamma_beta(g, b, c_p):
    """(2, c_p): row 0 = gamma, row 1 = beta; padded channels get 0 (stay zero)."""
    g = np.asarray(g, np.float32).reshape(-1)
    b = np.asarray(b, np.float32).reshape(-1)
    gb = np.zeros((2, c_p), np.float32)
    gb[0, : g.shape[0]] = g
    gb[1, : b.shape[0]] = b
    return jnp.asarray(gb)


# ----------------------------------------------------------------------------
# Kernel
# ----------------------------------------------------------------------------
def _make_double_conv_kernel(N, H):
    NH = N * H

    def row_masks(wc):
        # h-index of every (n, h) row, lane-wide.  H is a multiple of 8 here so
        # the leading-dim merge reshape is a tile-aligned no-op.
        h = lax.broadcasted_iota(jnp.int32, (N, H, wc), 1).reshape(NH, wc)
        return h == 0, h == (H - 1)

    def conv3x3(src, w_ref):
        """SAME 3x3 conv as three accumulating (NH,WCi)@(WCi,WCo) MXU dots.

        src: (NH, W*Cin_p) value; w_ref: (3, W*Cin_p, W*Cout_p) VMEM ref.
        Bands h-1 / h+1 are rolled values (XLU) + VPU mask -- no scratch.
        """
        top, bot = row_masks(src.shape[1])
        up = jnp.where(top, 0.0, pltpu.roll(src, shift=1, axis=0))        # row h-1
        dn = jnp.where(bot, 0.0, pltpu.roll(src, shift=NH - 1, axis=0))   # row h+1
        y = jnp.dot(up, w_ref[0], preferred_element_type=jnp.float32)
        y = y + jnp.dot(src, w_ref[1], preferred_element_type=jnp.float32)
        y = y + jnp.dot(dn, w_ref[2], preferred_element_type=jnp.float32)
        return y

    def bn_relu(y, pool_ref, bcast_ref, gb_ref):
        """Training-mode BatchNorm (batch stats, biased var) + ReLU, fused.

        Two stacked matmuls instead of four 1-row ones.
        """
        colsum = jnp.sum(y, axis=0, keepdims=True)                  # (1, WC)
        colsq = jnp.sum(y * y, axis=0, keepdims=True)               # (1, WC)
        stats = jnp.concatenate([colsum, colsq], axis=0)            # (2, WC)
        pooled = jnp.dot(stats, pool_ref[...],
                         preferred_element_type=jnp.float32)        # (2, C)
        mean = pooled[0:1, :]
        var = pooled[1:2, :] - mean * mean                          # biased batch var
        scale = gb_ref[0:1, :] * lax.rsqrt(var + EPS)               # (1, C)
        shift = gb_ref[1:2, :] - mean * scale                       # (1, C)
        ss = jnp.concatenate([scale, shift], axis=0)                # (2, C)
        ssw = jnp.dot(ss, bcast_ref[...],
                      preferred_element_type=jnp.float32)           # (2, WC)
        return jnp.maximum(y * ssw[0:1, :] + ssw[1:2, :], 0.0)      # one FMA + ReLU

    def kernel(x_ref, w1_ref, pool1_ref, bcast1_ref, gb1_ref,
               w2_ref, pool2_ref, bcast2_ref, gb2_ref, o_ref):
        y1 = bn_relu(conv3x3(x_ref[...], w1_ref), pool1_ref, bcast1_ref, gb1_ref)
        o_ref[...] = bn_relu(conv3x3(y1, w2_ref), pool2_ref, bcast2_ref, gb2_ref)

    return kernel


# ----------------------------------------------------------------------------
# Public wrapper
# ----------------------------------------------------------------------------
def double_conv(x_nchw, w1, g1, b1, w2, g2, b2):
    """x_nchw: (N, Cin, H, W); conv weights (9, Cin, Cout); gamma/beta (1, C).

    Returns (N, Cout, H, W), matching PyTorch training-mode forward of
    Conv3x3(no bias) -> BN -> ReLU -> Conv3x3(no bias) -> BN -> ReLU.
    """
    N, Cin, H, W = x_nchw.shape
    Cmid, Cout = w1.shape[2], w2.shape[2]
    Cin_p = _pad_channels(Cin, W)
    Cmid_p = _pad_channels(Cmid, W)
    Cout_p = _pad_channels(Cout, W)
    NH = N * H

    # NCHW -> NHWC, zero-pad channels to lane-dense width, flatten to (N*H, W*C_p).
    x = jnp.transpose(x_nchw, (0, 2, 3, 1)).astype(jnp.float32)
    x = jnp.pad(x, ((0, 0), (0, 0), (0, 0), (0, Cin_p - Cin)))
    x2d = x.reshape(NH, W * Cin_p)

    w1b = _band_matrices(w1, W, Cin_p, Cmid_p)       # (3, W*Cin_p,  W*Cmid_p)
    w2b = _band_matrices(w2, W, Cmid_p, Cout_p)      # (3, W*Cmid_p, W*Cout_p)
    pool1, bcast1 = _bn_mats(W, Cmid_p, N * H * W)
    pool2, bcast2 = _bn_mats(W, Cout_p, N * H * W)
    gb1 = _pack_gamma_beta(g1, b1, Cmid_p)
    gb2 = _pack_gamma_beta(g2, b2, Cout_p)

    kernel = _make_double_conv_kernel(N, H)
    vmem = pl.BlockSpec(memory_space=pltpu.MemorySpace.VMEM)

    out2d = pl.pallas_call(
        kernel,
        out_shape=jax.ShapeDtypeStruct((NH, W * Cout_p), jnp.float32),
        in_specs=[vmem] * 9,
        out_specs=vmem,
        compiler_params=pltpu.CompilerParams(vmem_limit_bytes=32 * 1024 * 1024),
    )(x2d, w1b, pool1, bcast1, gb1, w2b, pool2, bcast2, gb2)

    out = out2d.reshape(N, H, W, Cout_p)[..., :Cout]
    return jnp.transpose(out, (0, 3, 1, 2))          # -> NCHW


# ----------------------------------------------------------------------------
# Pure-JAX reference (same semantics) for correctness checking
# ----------------------------------------------------------------------------
def ref_double_conv(x_nchw, w1, g1, b1, w2, g2, b2):
    x = jnp.transpose(x_nchw, (0, 2, 3, 1)).astype(jnp.float32)

    def conv(y, w):
        wk = w.reshape(3, 3, w.shape[1], w.shape[2])
        return lax.conv_general_dilated(
            y, wk, window_strides=(1, 1), padding="SAME",
            dimension_numbers=("NHWC", "HWIO", "NHWC"))

    def bn_relu(y, g, b):
        mean = jnp.mean(y, axis=(0, 1, 2))
        var = jnp.mean((y - mean) ** 2, axis=(0, 1, 2))
        return jnp.maximum((y - mean) * lax.rsqrt(var + EPS) * g + b, 0.0)

    y = bn_relu(conv(x, w1), g1[0], b1[0])
    y = bn_relu(conv(y, w2), g2[0], b2[0])
    return jnp.transpose(y, (0, 3, 1, 2))


if __name__ == "__main__":
    # DoubleConv(in_channels=4, out_channels=8) -> mid_channels = in_channels = 4.
    N, Cin, H, W = 2, 4, 16, 16
    Cmid, Cout = Cin, 8

    key = jax.random.PRNGKey(0)
    kx, kw1, kw2, kg1, kb1, kg2, kb2 = jax.random.split(key, 7)

    x = jax.random.normal(kx, (N, Cin, H, W), jnp.float32)

    # Conv weights stored as (tap=9, Cin, Cout)  (== (3,3,Cin,Cout) reshaped).
    w1 = 0.2 * jax.random.normal(kw1, (9, Cin, Cmid), jnp.float32)
    w2 = 0.2 * jax.random.normal(kw2, (9, Cmid, Cout), jnp.float32)

    # BatchNorm affine params (gamma, beta), kept (1, C).
    g1 = 1.0 + 0.5 * jax.random.normal(kg1, (1, Cmid), jnp.float32)
    b1 = 0.1 * jax.random.normal(kb1, (1, Cmid), jnp.float32)
    g2 = 1.0 + 0.5 * jax.random.normal(kg2, (1, Cout), jnp.float32)
    b2 = 0.1 * jax.random.normal(kb2, (1, Cout), jnp.float32)

    out = jax.block_until_ready(double_conv(x, w1, g1, b1, w2, g2, b2))
    ref = jax.block_until_ready(ref_double_conv(x, w1, g1, b1, w2, g2, b2))

    assert out.shape == (N, Cout, H, W), out.shape
    np.testing.assert_allclose(np.asarray(out), np.asarray(ref),
                               rtol=1e-4, atol=1e-4)
    print("KERNEL_OK")
</pallas_src>

<mosaic_0001>
module attributes {stable_mosaic.version = 11 : i64} {
  func.func @kernel(%arg0: memref<32x128xf32, #tpu.memory_space<vmem>>, %arg1: memref<3x128x128xf32, #tpu.memory_space<vmem>>, %arg2: memref<128x8xf32, #tpu.memory_space<vmem>>, %arg3: memref<8x128xf32, #tpu.memory_space<vmem>>, %arg4: memref<2x8xf32, #tpu.memory_space<vmem>>, %arg5: memref<3x128x128xf32, #tpu.memory_space<vmem>>, %arg6: memref<128x8xf32, #tpu.memory_space<vmem>>, %arg7: memref<8x128xf32, #tpu.memory_space<vmem>>, %arg8: memref<2x8xf32, #tpu.memory_space<vmem>>, %arg9: memref<32x128xf32, #tpu.memory_space<vmem>>) attributes {dimension_semantics = [], scalar_prefetch = 0 : i64, scratch_operands = 0 : i64, tpu.core_type = #tpu.core_type<tc>} {
    %c0 = arith.constant 0 : index
    %c0_0 = arith.constant 0 : index
    %0 = vector.load %arg0[%c0, %c0_0] : memref<32x128xf32, #tpu.memory_space<vmem>>, vector<32x128xf32>
    %1 = tpu.iota {dimensions = array<i32: 1>} : vector<2x16x128xi32>
    %2 = vector.shape_cast %1 : vector<2x16x128xi32> to vector<32x128xi32>
    %c0_i32 = arith.constant 0 : i32
    %3 = vector.broadcast %c0_i32 : i32 to vector<32x128xi32>
    %4 = arith.cmpi eq, %2, %3 : vector<32x128xi32>
    %c15_i32 = arith.constant 15 : i32
    %5 = vector.broadcast %c15_i32 : i32 to vector<32x128xi32>
    %6 = arith.cmpi eq, %2, %5 : vector<32x128xi32>
    %c1_i32 = arith.constant 1 : i32
    %7 = tpu.dynamic_rotate %0 by %c1_i32 dim 0 : vector<32x128xf32>, i32 -> vector<32x128xf32>
    %cst = arith.constant 0.000000e+00 : f32
    %8 = vector.broadcast %cst : f32 to vector<32x128xf32>
    %9 = arith.select %4, %8, %7 : vector<32x128xi1>, vector<32x128xf32>
    %c31_i32 = arith.constant 31 : i32
    %10 = tpu.dynamic_rotate %0 by %c31_i32 dim 0 : vector<32x128xf32>, i32 -> vector<32x128xf32>
    %cst_1 = arith.constant 0.000000e+00 : f32
    %11 = vector.broadcast %cst_1 : f32 to vector<32x128xf32>
    %12 = arith.select %6, %11, %10 : vector<32x128xi1>, vector<32x128xf32>
    %c0_2 = arith.constant 0 : index
    %c0_3 = arith.constant 0 : index
    %c0_4 = arith.constant 0 : index
    %13 = vector.load %arg1[%c0_2, %c0_3, %c0_4] : memref<3x128x128xf32, #tpu.memory_space<vmem>>, vector<1x128x128xf32>
    %14 = vector.shape_cast %13 : vector<1x128x128xf32> to vector<128x128xf32>
    %cst_5 = arith.constant dense<0.000000e+00> : vector<32x128xf32>
    %15 = tpu.matmul %9, %14, %cst_5 {dimension_numbers = #tpu.dot_dimension_numbers<[1], [0], [0], [1], [0, 0, 1, 1], [], []>} : vector<32x128xf32>, vector<128x128xf32>, vector<32x128xf32> -> vector<32x128xf32>
    %c1 = arith.constant 1 : index
    %c0_6 = arith.constant 0 : index
    %c0_7 = arith.constant 0 : index
    %16 = vector.load %arg1[%c1, %c0_6, %c0_7] : memref<3x128x128xf32, #tpu.memory_space<vmem>>, vector<1x128x128xf32>
    %17 = vector.shape_cast %16 : vector<1x128x128xf32> to vector<128x128xf32>
    %cst_8 = arith.constant dense<0.000000e+00> : vector<32x128xf32>
    %18 = tpu.matmul %0, %17, %cst_8 {dimension_numbers = #tpu.dot_dimension_numbers<[1], [0], [0], [1], [0, 0, 1, 1], [], []>} : vector<32x128xf32>, vector<128x128xf32>, vector<32x128xf32> -> vector<32x128xf32>
    %19 = arith.addf %15, %18 : vector<32x128xf32>
    %c2 = arith.constant 2 : index
    %c0_9 = arith.constant 0 : index
    %c0_10 = arith.constant 0 : index
    %20 = vector.load %arg1[%c2, %c0_9, %c0_10] : memref<3x128x128xf32, #tpu.memory_space<vmem>>, vector<1x128x128xf32>
    %21 = vector.shape_cast %20 : vector<1x128x128xf32> to vector<128x128xf32>
    %cst_11 = arith.constant dense<0.000000e+00> : vector<32x128xf32>
    %22 = tpu.matmul %12, %21, %cst_11 {dimension_numbers = #tpu.dot_dimension_numbers<[1], [0], [0], [1], [0, 0, 1, 1], [], []>} : vector<32x128xf32>, vector<128x128xf32>, vector<32x128xf32> -> vector<32x128xf32>
    %23 = arith.addf %19, %22 : vector<32x128xf32>
    %cst_12 = arith.constant dense<0.000000e+00> : vector<128xf32>
    %24 = vector.multi_reduction <add>, %23, %cst_12 [0] : vector<32x128xf32> to vector<128xf32>
    %25 = vector.shape_cast %24 : vector<128xf32> to vector<1x128xf32>
    %26 = arith.mulf %23, %23 : vector<32x128xf32>
    %cst_13 = arith.constant dense<0.000000e+00> : vector<128xf32>
    %27 = vector.multi_reduction <add>, %26, %cst_13 [0] : vector<32x128xf32> to vector<128xf32>
    %28 = vector.shape_cast %27 : vector<128xf32> to vector<1x128xf32>
    %29 = tpu.concatenate %25, %28 in 0 : vector<1x128xf32>, vector<1x128xf32> -> vector<2x128xf32>
    %c0_14 = arith.constant 0 : index
    %c0_15 = arith.constant 0 : index
    %30 = vector.load %arg2[%c0_14, %c0_15] : memref<128x8xf32, #tpu.memory_space<vmem>>, vector<128x8xf32>
    %cst_16 = arith.constant dense<0.000000e+00> : vector<2x8xf32>
    %31 = tpu.matmul %29, %30, %cst_16 {dimension_numbers = #tpu.dot_dimension_numbers<[1], [0], [0], [1], [0, 0, 1, 1], [], []>} : vector<2x128xf32>, vector<128x8xf32>, vector<2x8xf32> -> vector<2x8xf32>
    %32 = vector.extract_strided_slice %31 {offsets = [0, 0], sizes = [1, 8], strides = [1, 1]} : vector<2x8xf32> to vector<1x8xf32>
    %33 = vector.extract_strided_slice %31 {offsets = [1, 0], sizes = [1, 8], strides = [1, 1]} : vector<2x8xf32> to vector<1x8xf32>
    %34 = arith.mulf %32, %32 : vector<1x8xf32>
    %35 = arith.subf %33, %34 : vector<1x8xf32>
    %c0_17 = arith.constant 0 : index
    %c0_18 = arith.constant 0 : index
    %36 = vector.load %arg4[%c0_17, %c0_18] : memref<2x8xf32, #tpu.memory_space<vmem>>, vector<1x8xf32>
    %cst_19 = arith.constant 9.99999974E-6 : f32
    %37 = vector.broadcast %cst_19 : f32 to vector<1x8xf32>
    %38 = arith.addf %35, %37 : vector<1x8xf32>
    %39 = math.rsqrt %38 : vector<1x8xf32>
    %40 = arith.mulf %36, %39 : vector<1x8xf32>
    %c1_20 = arith.constant 1 : index
    %c0_21 = arith.constant 0 : index
    %41 = vector.load %arg4[%c1_20, %c0_21] : memref<2x8xf32, #tpu.memory_space<vmem>>, vector<1x8xf32>
    %42 = arith.mulf %32, %40 : vector<1x8xf32>
    %43 = arith.subf %41, %42 : vector<1x8xf32>
    %44 = tpu.concatenate %40, %43 in 0 : vector<1x8xf32>, vector<1x8xf32> -> vector<2x8xf32>
    %c0_22 = arith.constant 0 : index
    %c0_23 = arith.constant 0 : index
    %45 = vector.load %arg3[%c0_22, %c0_23] : memref<8x128xf32, #tpu.memory_space<vmem>>, vector<8x128xf32>
    %cst_24 = arith.constant dense<0.000000e+00> : vector<2x128xf32>
    %46 = tpu.matmul %44, %45, %cst_24 {dimension_numbers = #tpu.dot_dimension_numbers<[1], [0], [0], [1], [0, 0, 1, 1], [], []>} : vector<2x8xf32>, vector<8x128xf32>, vector<2x128xf32> -> vector<2x128xf32>
    %47 = vector.extract_strided_slice %46 {offsets = [0, 0], sizes = [1, 128], strides = [1, 1]} : vector<2x128xf32> to vector<1x128xf32>
    %48 = vector.broadcast %47 : vector<1x128xf32> to vector<32x128xf32>
    %49 = arith.mulf %23, %48 : vector<32x128xf32>
    %50 = vector.extract_strided_slice %46 {offsets = [1, 0], sizes = [1, 128], strides = [1, 1]} : vector<2x128xf32> to vector<1x128xf32>
    %51 = vector.broadcast %50 : vector<1x128xf32> to vector<32x128xf32>
    %52 = arith.addf %49, %51 : vector<32x128xf32>
    %cst_25 = arith.constant 0.000000e+00 : f32
    %53 = vector.broadcast %cst_25 : f32 to vector<32x128xf32>
    %54 = arith.maximumf %52, %53 : vector<32x128xf32>
    %55 = tpu.iota {dimensions = array<i32: 1>} : vector<2x16x128xi32>
    %56 = vector.shape_cast %55 : vector<2x16x128xi32> to vector<32x128xi32>
    %c0_i32_26 = arith.constant 0 : i32
    %57 = vector.broadcast %c0_i32_26 : i32 to vector<32x128xi32>
    %58 = arith.cmpi eq, %56, %57 : vector<32x128xi32>
    %c15_i32_27 = arith.constant 15 : i32
    %59 = vector.broadcast %c15_i32_27 : i32 to vector<32x128xi32>
    %60 = arith.cmpi eq, %56, %59 : vector<32x128xi32>
    %c1_i32_28 = arith.constant 1 : i32
    %61 = tpu.dynamic_rotate %54 by %c1_i32_28 dim 0 : vector<32x128xf32>, i32 -> vector<32x128xf32>
    %cst_29 = arith.constant 0.000000e+00 : f32
    %62 = vector.broadcast %cst_29 : f32 to vector<32x128xf32>
    %63 = arith.select %58, %62, %61 : vector<32x128xi1>, vector<32x128xf32>
    %c31_i32_30 = arith.constant 31 : i32
    %64 = tpu.dynamic_rotate %54 by %c31_i32_30 dim 0 : vector<32x128xf32>, i32 -> vector<32x128xf32>
    %cst_31 = arith.constant 0.000000e+00 : f32
    %65 = vector.broadcast %cst_31 : f32 to vector<32x128xf32>
    %66 = arith.select %60, %65, %64 : vector<32x128xi1>, vector<32x128xf32>
    %c0_32 = arith.constant 0 : index
    %c0_33 = arith.constant 0 : index
    %c0_34 = arith.constant 0 : index
    %67 = vector.load %arg5[%c0_32, %c0_33, %c0_34] : memref<3x128x128xf32, #tpu.memory_space<vmem>>, vector<1x128x128xf32>
    %68 = vector.shape_cast %67 : vector<1x128x128xf32> to vector<128x128xf32>
    %cst_35 = arith.constant dense<0.000000e+00> : vector<32x128xf32>
    %69 = tpu.matmul %63, %68, %cst_35 {dimension_numbers = #tpu.dot_dimension_numbers<[1], [0], [0], [1], [0, 0, 1, 1], [], []>} : vector<32x128xf32>, vector<128x128xf32>, vector<32x128xf32> -> vector<32x128xf32>
    %c1_36 = arith.constant 1 : index
    %c0_37 = arith.constant 0 : index
    %c0_38 = arith.constant 0 : index
    %70 = vector.load %arg5[%c1_36, %c0_37, %c0_38] : memref<3x128x128xf32, #tpu.memory_space<vmem>>, vector<1x128x128xf32>
    %71 = vector.shape_cast %70 : vector<1x128x128xf32> to vector<128x128xf32>
    %cst_39 = arith.constant dense<0.000000e+00> : vector<32x128xf32>
    %72 = tpu.matmul %54, %71, %cst_39 {dimension_numbers = #tpu.dot_dimension_numbers<[1], [0], [0], [1], [0, 0, 1, 1], [], []>} : vector<32x128xf32>, vector<128x128xf32>, vector<32x128xf32> -> vector<32x128xf32>
    %73 = arith.addf %69, %72 : vector<32x128xf32>
    %c2_40 = arith.constant 2 : index
    %c0_41 = arith.constant 0 : index
    %c0_42 = arith.constant 0 : index
    %74 = vector.load %arg5[%c2_40, %c0_41, %c0_42] : memref<3x128x128xf32, #tpu.memory_space<vmem>>, vector<1x128x128xf32>
    %75 = vector.shape_cast %74 : vector<1x128x128xf32> to vector<128x128xf32>
    %cst_43 = arith.constant dense<0.000000e+00> : vector<32x128xf32>
    %76 = tpu.matmul %66, %75, %cst_43 {dimension_numbers = #tpu.dot_dimension_numbers<[1], [0], [0], [1], [0, 0, 1, 1], [], []>} : vector<32x128xf32>, vector<128x128xf32>, vector<32x128xf32> -> vector<32x128xf32>
    %77 = arith.addf %73, %76 : vector<32x128xf32>
    %cst_44 = arith.constant dense<0.000000e+00> : vector<128xf32>
    %78 = vector.multi_reduction <add>, %77, %cst_44 [0] : vector<32x128xf32> to vector<128xf32>
    %79 = vector.shape_cast %78 : vector<128xf32> to vector<1x128xf32>
    %80 = arith.mulf %77, %77 : vector<32x128xf32>
    %cst_45 = arith.constant dense<0.000000e+00> : vector<128xf32>
    %81 = vector.multi_reduction <add>, %80, %cst_45 [0] : vector<32x128xf32> to vector<128xf32>
    %82 = vector.shape_cast %81 : vector<128xf32> to vector<1x128xf32>
    %83 = tpu.concatenate %79, %82 in 0 : vector<1x128xf32>, vector<1x128xf32> -> vector<2x128xf32>
    %c0_46 = arith.constant 0 : index
    %c0_47 = arith.constant 0 : index
    %84 = vector.load %arg6[%c0_46, %c0_47] : memref<128x8xf32, #tpu.memory_space<vmem>>, vector<128x8xf32>
    %cst_48 = arith.constant dense<0.000000e+00> : vector<2x8xf32>
    %85 = tpu.matmul %83, %84, %cst_48 {dimension_numbers = #tpu.dot_dimension_numbers<[1], [0], [0], [1], [0, 0, 1, 1], [], []>} : vector<2x128xf32>, vector<128x8xf32>, vector<2x8xf32> -> vector<2x8xf32>
    %86 = vector.extract_strided_slice %85 {offsets = [0, 0], sizes = [1, 8], strides = [1, 1]} : vector<2x8xf32> to vector<1x8xf32>
    %87 = vector.extract_strided_slice %85 {offsets = [1, 0], sizes = [1, 8], strides = [1, 1]} : vector<2x8xf32> to vector<1x8xf32>
    %88 = arith.mulf %86, %86 : vector<1x8xf32>
    %89 = arith.subf %87, %88 : vector<1x8xf32>
    %c0_49 = arith.constant 0 : index
    %c0_50 = arith.constant 0 : index
    %90 = vector.load %arg8[%c0_49, %c0_50] : memref<2x8xf32, #tpu.memory_space<vmem>>, vector<1x8xf32>
    %cst_51 = arith.constant 9.99999974E-6 : f32
    %91 = vector.broadcast %cst_51 : f32 to vector<1x8xf32>
    %92 = arith.addf %89, %91 : vector<1x8xf32>
    %93 = math.rsqrt %92 : vector<1x8xf32>
    %94 = arith.mulf %90, %93 : vector<1x8xf32>
    %c1_52 = arith.constant 1 : index
    %c0_53 = arith.constant 0 : index
    %95 = vector.load %arg8[%c1_52, %c0_53] : memref<2x8xf32, #tpu.memory_space<vmem>>, vector<1x8xf32>
    %96 = arith.mulf %86, %94 : vector<1x8xf32>
    %97 = arith.subf %95, %96 : vector<1x8xf32>
    %98 = tpu.concatenate %94, %97 in 0 : vector<1x8xf32>, vector<1x8xf32> -> vector<2x8xf32>
    %c0_54 = arith.constant 0 : index
    %c0_55 = arith.constant 0 : index
    %99 = vector.load %arg7[%c0_54, %c0_55] : memref<8x128xf32, #tpu.memory_space<vmem>>, vector<8x128xf32>
    %cst_56 = arith.constant dense<0.000000e+00> : vector<2x128xf32>
    %100 = tpu.matmul %98, %99, %cst_56 {dimension_numbers = #tpu.dot_dimension_numbers<[1], [0], [0], [1], [0, 0, 1, 1], [], []>} : vector<2x8xf32>, vector<8x128xf32>, vector<2x128xf32> -> vector<2x128xf32>
    %101 = vector.extract_strided_slice %100 {offsets = [0, 0], sizes = [1, 128], strides = [1, 1]} : vector<2x128xf32> to vector<1x128xf32>
    %102 = vector.broadcast %101 : vector<1x128xf32> to vector<32x128xf32>
    %103 = arith.mulf %77, %102 : vector<32x128xf32>
    %104 = vector.extract_strided_slice %100 {offsets = [1, 0], sizes = [1, 128], strides = [1, 1]} : vector<2x128xf32> to vector<1x128xf32>
    %105 = vector.broadcast %104 : vector<1x128xf32> to vector<32x128xf32>
    %106 = arith.addf %103, %105 : vector<32x128xf32>
    %cst_57 = arith.constant 0.000000e+00 : f32
    %107 = vector.broadcast %cst_57 : f32 to vector<32x128xf32>
    %108 = arith.maximumf %106, %107 : vector<32x128xf32>
    %c0_58 = arith.constant 0 : index
    %c0_59 = arith.constant 0 : index
    %109 = vector.load %arg9[%c0_58, %c0_59] : memref<32x128xf32, #tpu.memory_space<vmem>>, vector<32x128xf32>
    tpu.vector_store %arg9[%c0_58, %c0_59], %108 {strides = array<i32>} : memref<32x128xf32, #tpu.memory_space<vmem>>, vector<32x128xf32>,
    return
  }
}

</mosaic_0001>

<bundles_post_ra>
// kernel: tpu_custom_call.1
= control target key start
LH: loop header
LB: loop body
LE: loop exit
PB: predicated region body
PF: predicated region fallthrough
CT: control target
= control target key end

     0   :  { %14 = vsyncpa [#allocation3], 0  ;;  %s2415_s0 = inlined_call_operand.vmem [shape: f32[32,128], index: 0, kind: input, shape index: {}]   ;;  %s2416_s1 = inlined_call_operand.hbm [shape: f32[3,128,128], index: 1, kind: input, shape index: {}]   ;;  %s2417_s2 = inlined_call_operand.vmem [shape: f32[128,8], index: 2, kind: input, shape index: {}]   ;;  %s2418_s3 = inlined_call_operand.vmem [shape: f32[8,128], index: 3, kind: input, shape index: {}]   ;;  %s2419_s4 = inlined_call_operand.vmem [shape: f32[2,8], index: 4, kind: input, shape index: {}]   ;;  %s2420_s5 = inlined_call_operand.hbm [shape: f32[3,128,128], index: 5, kind: input, shape index: {}]   ;;  %s2421_s6 = inlined_call_operand.vmem [shape: f32[128,8], index: 6, kind: input, shape index: {}]   ;;  %s2422_s7 = inlined_call_operand.vmem [shape: f32[8,128], index: 7, kind: input, shape index: {}]   ;;  %s2423_s8 = inlined_call_operand.vmem [shape: f32[2,8], index: 8, kind: input, shape index: {}]   ;;  %s2424_s9 = inlined_call_operand.hbm [shape: f32[32,128], index: 9, kind: output, shape index: {}]  }
   0x1   :  { %15 = vsyncpa [#allocation6], 0 }
   0x2   :  { %16 = vsyncpa [#allocation4], 0  ;;  %s2034_s30 = smov [#allocation2]   ;;  %s1962_s13 = scalar_lea.hbm %s2416_s1, 6144 }
   0x3   :  { %s24_s10 = sshll.u32 %s2034_s30, 4  ;;  %p1963_p0 = scmp.ne.s32.totalorder %s2416_s1, %s1962_s13  ;;  %s25_s10 = int_to_ptr.vmem [resolvable:$true] %s24_s10 }
   0x4   :  { %p1966_p1 = scmp.lt.u32.totalorder %s1962_s13, %s2416_s1 }
   0x6   :  { %p1968_p2 = pnand %p1966_p1, %p1963_p0 }
   0x8   :  { %1971 = shalt.err (!%p1968_p2)
}
   0x9   :  { %s1972_s18 = scalar_lea.vmem %s25_s10, 6144  ;;  %p1977_p4 = scmp.lt.s32.totalorder %s25_s10, %s25_s10 }
   0xa   :  { %p1973_p3 = scmp.ne.s32.totalorder %s25_s10, %s1972_s18  ;;  %p1978_p5 = scmp.lt.s32.totalorder %s1972_s18, %s1972_s18 }
   0xc   :  { %p1979_p6 = por %p1978_p5, %p1977_p4 }
   0xe   :  { %p1980_p7 = pnand %p1979_p6, %p1973_p3 }
  0x10   :  { %1983 = shalt.err (!%p1980_p7)
}
  0x11   :  { %s2035_s19 = smov 128   ;;  %s2036_s20 = smov 8  }
  0x12   :  { %30 = dma.hbm_to_vmem [thread:$0]  %s2416_s1, 6144, %s25_s10, [#allocation3], %s2035_s19, %s2035_s19, %s2036_s20  }
  0x13   :  { %s2037_s23 = smov [#allocation5]   ;;  %s1984_s27 = scalar_lea.hbm %s2420_s5, 6144 }
  0x14   :  { %s42_s24 = sshll.u32 %s2037_s23, 4  ;;  %p1985_p8 = scmp.ne.s32.totalorder %s2420_s5, %s1984_s27  ;;  %s43_s24 = int_to_ptr.vmem [resolvable:$true] %s42_s24 }
  0x15   :  { %p1988_p9 = scmp.lt.u32.totalorder %s1984_s27, %s2420_s5 }
  0x17   :  { %p1990_p10 = pnand %p1988_p9, %p1985_p8 }
  0x19   :  { %1993 = shalt.err (!%p1990_p10)
}
  0x1a   :  { %s1994_s12 = scalar_lea.vmem %s43_s24, 6144  ;;  %p1999_p12 = scmp.lt.s32.totalorder %s43_s24, %s43_s24 }
  0x1b   :  { %p1995_p11 = scmp.ne.s32.totalorder %s43_s24, %s1994_s12  ;;  %p2000_p13 = scmp.lt.s32.totalorder %s1994_s12, %s1994_s12 }
  0x1d   :  { %p2001_p0 = por %p2000_p13, %p1999_p12 }
  0x1f   :  { %p2002_p1 = pnand %p2001_p0, %p1995_p11 }
  0x21   :  { %2005 = shalt.err (!%p2002_p1)
}
  0x22   :  { %48 = dma.hbm_to_vmem [thread:$0]  %s2420_s5, 6144, %s43_s24, [#allocation6], %s2035_s19, %s2035_s19, %s2036_s20  }
  0x23   :  { %2028 = dma.done.wait [#allocation3], 6144  }
  0x24   :  { %2029 = vsyncadd [#allocation3], 4294961152 }
  0x25   :  { %2030 = dma.done.wait [#allocation6], 6144  }
  0x26   :  { %2031 = vsyncadd [#allocation6], 4294961152  ;;  %v2038_v0 = vmov 0.0|0.0   ;;  %v115_v1 = vld [vmem:[#allocation2 + $0x80] sm:$0xff]  ;;  %v116_v2 = vld [vmem:[#allocation2 + $0x88] sm:$0xff]  ;;  %v65_v34 = vlaneseq  ;;  %vm2039_vm4 = vmmov 0  }
  0x27   :  { %1790 = vmatprep.subr.bf16.mxu1 %v2038_v0  ;;  %v117_v3 = vld [vmem:[#allocation2 + $0x90] sm:$0xff]  ;;  %v1694_v4 = vpack.c.bf16 %v116_v2, %v115_v1  ;;  %v118_v5 = vld [vmem:[#allocation2 + $0x98] sm:$0xff]  ;;  %v119_v7 = vld [vmem:[#allocation2 + $0xa0] sm:$0xff]  ;;  %vm429_vm5 = vcmask 1040384   ;;  %vm537_vm6 = vcmask 64512  }
  0x28   :  { %v1698_v6 = vpack.c.bf16 %v118_v5, %v117_v3  ;;  %v120_v8 = vld [vmem:[#allocation2 + $0xa8] sm:$0xff]  ;;  %v2126_v10 = vld [vmem:[%s2415_s0] sm:$0xff]  ;;  %v121_v11 = vld [vmem:[#allocation2 + $0xb0] sm:$0xff]  ;;  %v2148_v39 = vshrl.u32 %v65_v34, 7 }
  0x29   :  { %1695 = vmatprep.subr.bf16.mxu0 %v1694_v4  ;;  %v1702_v9 = vpack.c.bf16 %v120_v8, %v119_v7  ;;  %v122_v12 = vld [vmem:[#allocation2 + $0xb8] sm:$0xff]  ;;  %1418 = vmatprep.mubr.f32.mxu0 %v2126_v10  ;;  %v123_v14 = vld [vmem:[#allocation2 + $0xc0] sm:$0xff]  ;;  %v124_v15 = vld [vmem:[#allocation2 + $0xc8] sm:$0xff]  ;;  %v72_v41 = vrot.slane %v2126_v10, 7 }
  0x2a   :  { %1697 = vmatpush3.bf16.msra.mxu0 %v1694_v4  ;;  %v1706_v13 = vpack.c.bf16 %v122_v12, %v121_v11  ;;  %v1710_v16 = vpack.c.bf16 %v124_v15, %v123_v14  ;;  %v125_v17 = vld [vmem:[#allocation2 + $0xd0] sm:$0xff]  ;;  %v126_v18 = vld [vmem:[#allocation2 + $0xd8] sm:$0xff]  ;;  %v127_v20 = vld [vmem:[#allocation2 + $0xe0] sm:$0xff]  ;;  %vm76_vm0 = vcmp.lt.s32.totalorder %v2148_v39, 1  ;;  %vm1226_vm1 = vcmp.ne.s32.totalorder %v2148_v39, 0 }
  0x2b   :  { %1699 = vmatprep.subr.bf16.mxu0 %v1698_v6  ;;  %v1714_v19 = vpack.c.bf16 %v126_v18, %v125_v17  ;;  %v431_v21 = vld [vmem:[%s2417_s2] sm:$0xff]  ;;  %v432_v22 = vld [vmem:[%s2417_s2 + $0x8] sm:$0xff]  ;;  %v433_v25 = vld [vmem:[%s2417_s2 + $0x10] sm:$0xff]  ;;  %vm89_vm2 = vcmp.lt.s32.totalorder %v2148_v39, 7  ;;  %v2188_v34 = vadd.s32 8, %v2148_v39 }
  0x2c   :  { %v128_v23 = vld [vmem:[#allocation2 + $0xe8] sm:$0xff]  ;;  %v1791_v24 = vpack.c.bf16 %v432_v22, %v431_v21  ;;  %v434_v26 = vld [vmem:[%s2417_s2 + $0x18] sm:$0xff]  ;;  %v129_v29 = vld [vmem:[#allocation2 + $0xf0] sm:$0xff] }
  0x2d   :  { %v1794_v27 = vpack.c.bf16 %v434_v26, %v433_v25  ;;  %v1718_v28 = vpack.c.bf16 %v128_v23, %v127_v20  ;;  %v130_v30 = vld [vmem:[#allocation2 + $0xf8] sm:$0xff]  ;;  %v98_v32 = vld [vmem:[#allocation2] sm:$0xff]  ;;  %v99_v33 = vld [vmem:[#allocation2 + $0x8] sm:$0xff]  ;;  %vm1227_vm3 = vcmp.ne.s32.totalorder %v2188_v34, 15 }
  0x2e   :  { %1701 = vmatpush3.bf16.msra.mxu0 %v1698_v6  ;;  %1792 = vmatpush3.bf16.msra.mxu1 %v1791_v24  ;;  %v1722_v31 = vpack.c.bf16 %v130_v30, %v129_v29  ;;  %v1726_v35 = vpack.c.bf16 %v99_v33, %v98_v32  ;;  %v100_v36 = vld [vmem:[#allocation2 + $0x10] sm:$0xff]  ;;  %v101_v37 = vld [vmem:[#allocation2 + $0x18] sm:$0xff]  ;;  %v2153_v40 = vld [vmem:[%s2415_s0 + $0x8] sm:$0xff] }
  0x2f   :  { %1703 = vmatprep.subr.bf16.mxu0 %v1702_v9  ;;  %1793 = vmatprep.subr.bf16.mxu1 %v2038_v0  ;;  %v2146_v38 = vld [vmem:[%s2415_s0 + $0x18] sm:$0xff]  ;;  %v1730_v42 = vpack.c.bf16 %v101_v37, %v100_v36  ;;  %v2159_v43 = vld [vmem:[%s2415_s0 + $0x10] sm:$0xff]  ;;  %v102_v45 = vld [vmem:[#allocation2 + $0x20] sm:$0xff]  ;;  %v73_v3 = vrot.slane %v2153_v40, 7  ;;  %v86_v11 = vrot.slane %v2153_v40, 1 }
  0x30   :  { %v75_v44 = vrot.slane %v2146_v38, 7  ;;  %v103_v46 = vld [vmem:[#allocation2 + $0x28] sm:$0xff]  ;;  %v104_v49 = vld [vmem:[#allocation2 + $0x30] sm:$0xff]  ;;  %v105_v50 = vld [vmem:[#allocation2 + $0x38] sm:$0xff]  ;;  %v74_v4 = vrot.slane %v2159_v43, 7  ;;  %v87_v33 = vrot.slane %v2159_v43, 1 }
  0x31   :  { %v1734_v47 = vpack.c.bf16 %v103_v46, %v102_v45  ;;  %v1738_v51 = vpack.c.bf16 %v105_v50, %v104_v49  ;;  %v106_v52 = vld [vmem:[#allocation2 + $0x40] sm:$0xff]  ;;  %v107_v53 = vld [vmem:[#allocation2 + $0x48] sm:$0xff]  ;;  %v108_v55 = vld [vmem:[#allocation2 + $0x50] sm:$0xff]  ;;  %v79_v8 = vsel %vm76_vm0, %v72_v41, %v73_v3 }
  0x32   :  { %1705 = vmatpush3.bf16.msra.mxu0 %v1702_v9  ;;  %1795 = vmatpush3.bf16.msra.mxu1 %v1794_v27  ;;  %v80_v48 = vsel %vm76_vm0, %v75_v44, %v72_v41  ;;  %v1742_v54 = vpack.c.bf16 %v107_v53, %v106_v52  ;;  %v109_v56 = vld [vmem:[#allocation2 + $0x58] sm:$0xff]  ;;  %v110_v58 = vld [vmem:[#allocation2 + $0x60] sm:$0xff]  ;;  %v111_v59 = vld [vmem:[#allocation2 + $0x68] sm:$0xff]  ;;  %v85_v9 = vrot.slane %v2126_v10, 1  ;;  %v91_v36 = vsel %vm89_vm2, %v86_v11, %v87_v33 }
  0x33   :  { %1707 = vmatprep.subr.bf16.mxu0 %v1706_v13  ;;  %1796 = vmatprep.subr.bf16.mxu1 %v2038_v0  ;;  %v1746_v57 = vpack.c.bf16 %v109_v56, %v108_v55  ;;  %v1750_v60 = vpack.c.bf16 %v111_v59, %v110_v58  ;;  %v112_v61 = vld [vmem:[#allocation2 + $0x70] sm:$0xff]  ;;  %v113_v62 = vld [vmem:[#allocation2 + $0x78] sm:$0xff]  ;;  %v302_v1 = vld [vmem:[#allocation2 + $0x100] sm:$0xff] }
  0x34   :  { %v1754_v63 = vpack.c.bf16 %v113_v62, %v112_v61  ;;  %v303_v2 = vld [vmem:[#allocation2 + $0x108] sm:$0xff]  ;;  %v304_v6 = vld [vmem:[#allocation2 + $0x110] sm:$0xff]  ;;  %v305_v7 = vld [vmem:[#allocation2 + $0x118] sm:$0xff]  ;;  %v92_v17 = vsel %vm89_vm2, %v85_v9, %v86_v11 }
  0x35   :  { %v1758_v5 = vpack.c.bf16 %v303_v2, %v302_v1  ;;  %v1762_v12 = vpack.c.bf16 %v305_v7, %v304_v6  ;;  %v306_v14 = vld [vmem:[#allocation2 + $0x120] sm:$0xff]  ;;  %v307_v15 = vld [vmem:[#allocation2 + $0x128] sm:$0xff]  ;;  %v308_v18 = vld [vmem:[#allocation2 + $0x130] sm:$0xff] }
  0x36   :  { %1709 = vmatpush3.bf16.msra.mxu0 %v1706_v13  ;;  %v78_v13 = vsel %vm76_vm0, %v73_v3, %v74_v4  ;;  %v1766_v10 = vpack.c.bf16 %v307_v15, %v306_v14  ;;  %v310_v21 = vld [vmem:[#allocation2 + $0x140] sm:$0xff]  ;;  %v311_v22 = vld [vmem:[#allocation2 + $0x148] sm:$0xff]  ;;  %v312_v24 = vld [vmem:[#allocation2 + $0x150] sm:$0xff] }
  0x37   :  { %1711 = vmatprep.subr.bf16.mxu0 %v1710_v16  ;;  %v1774_v23 = vpack.c.bf16 %v311_v22, %v310_v21  ;;  %v313_v25 = vld [vmem:[#allocation2 + $0x158] sm:$0xff]  ;;  %v314_v27 = vld [vmem:[#allocation2 + $0x160] sm:$0xff]  ;;  %v316_v30 = vld [vmem:[#allocation2 + $0x170] sm:$0xff] }
  0x38   :  { %v1778_v26 = vpack.c.bf16 %v313_v25, %v312_v24  ;;  %v436_v41 = vld [vmem:[%s2417_s2 + $0x28] sm:$0xff]  ;;  %v439_v46 = vld [vmem:[%s2417_s2 + $0x40] sm:$0xff]  ;;  %v441_v49 = vld [vmem:[%s2417_s2 + $0x50] sm:$0xff] }
  0x39   :  { %v442_v50 = vld [vmem:[%s2417_s2 + $0x58] sm:$0xff]  ;;  %v443_v52 = vld [vmem:[%s2417_s2 + $0x60] sm:$0xff]  ;;  %v444_v53 = vld [vmem:[%s2417_s2 + $0x68] sm:$0xff] }
  0x3a   :  { %1713 = vmatpush3.bf16.msra.mxu0 %v1710_v16  ;;  %v77_v16 = vsel %vm76_vm0, %v74_v4, %v75_v44  ;;  %v438_v44 = vld [vmem:[%s2417_s2 + $0x38] sm:$0xff]  ;;  %v445_v55 = vld [vmem:[%s2417_s2 + $0x70] sm:$0xff]  ;;  %v672_v24 = vld [vmem:[#allocation5 + $0x80] sm:$0xff] }
  0x3b   :  { %1715 = vmatprep.subr.bf16.mxu0 %v1714_v19  ;;  %v446_v56 = vld [vmem:[%s2417_s2 + $0x78] sm:$0xff]  ;;  %v673_v25 = vld [vmem:[#allocation5 + $0x88] sm:$0xff] }
  0x3c   :  { %v1812_v58 = vpack.c.bf16 %v446_v56, %v445_v55  ;;  %v682_v56 = vld [vmem:[#allocation5 + $0xd0] sm:$0xff]  ;;  %v994_v34 = vld [vmem:[%s2421_s6 + $0x38] sm:$0xff] }
  0x3e   :  { %1717 = vmatpush3.bf16.msra.mxu0 %v1714_v19  ;;  %v309_v19 = vld [vmem:[#allocation2 + $0x138] sm:$0xff] }
  0x3f   :  { %1719 = vmatprep.subr.bf16.mxu0 %v1718_v28  ;;  %v1770_v20 = vpack.c.bf16 %v309_v19, %v308_v18 }
  0x42   :  { %1721 = vmatpush3.bf16.msra.mxu0 %v1718_v28  ;;  %v315_v28 = vld [vmem:[#allocation2 + $0x168] sm:$0xff] }
  0x43   :  { %1723 = vmatprep.subr.bf16.mxu0 %v1722_v31  ;;  %v1782_v29 = vpack.c.bf16 %v315_v28, %v314_v27 }
  0x46   :  { %1725 = vmatpush3.bf16.msra.mxu0 %v1722_v31  ;;  %v317_v31 = vld [vmem:[#allocation2 + $0x178] sm:$0xff] }
  0x47   :  { %1727 = vmatprep.subr.bf16.mxu0 %v1726_v35  ;;  %v1786_v32 = vpack.c.bf16 %v317_v31, %v316_v30 }
  0x49   :  { %1419 = vmatmul.mubr.f32.vlgmr.msra.gmra.mrb[0].mxu0 %v2153_v40 }
  0x4a   :  { %1729 = vmatpush3.bf16.msra.mxu0 %v1726_v35  ;;  %1421 = vmatprep.mubr.f32.mxu0 %v2159_v43  ;;  %v88_v35 = vrot.slane %v2146_v38, 1  ;;  %v437_v43 = vld [vmem:[%s2417_s2 + $0x30] sm:$0xff] }
  0x4b   :  { %1731 = vmatprep.subr.bf16.mxu0 %v1730_v42  ;;  %v1800_v45 = vpack.c.bf16 %v438_v44, %v437_v43  ;;  %v675_v43 = vld [vmem:[#allocation5 + $0x98] sm:$0xff] }
  0x4c   :  { %v90_v37 = vsel %vm89_vm2, %v87_v33, %v88_v35  ;;  %v93_v40 = vsel %vm89_vm2, %v88_v35, %v85_v9  ;;  %v522_v35 = vld [vmem:[%s2419_s4] sm:$0x1] }
  0x4d   :  { %1422 = vmatmul.mubr.f32.gmra.mrb[2].mxu0 %v2146_v38  ;;  %v435_v38 = vld [vmem:[%s2417_s2 + $0x20] sm:$0xff] }
  0x4e   :  { %1733 = vmatpush3.bf16.msra.mxu0 %v1730_v42  ;;  %1456 = vmatprep.mubr.msk.f32.mxu0 %vm1226_vm1, %v80_v48  ;;  %v1797_v42 = vpack.c.bf16 %v436_v41, %v435_v38 }
  0x4f   :  { %1735 = vmatprep.subr.bf16.mxu0 %v1734_v47 }
  0x50   :  { %1798 = vmatpush3.bf16.msra.mxu1 %v1797_v42  ;;  %v674_v42 = vld [vmem:[#allocation5 + $0x90] sm:$0xff] }
  0x51   :  { %1799 = vmatprep.subr.bf16.mxu1 %v2038_v0 }
  0x52   :  { %1737 = vmatpush3.bf16.msra.mxu0 %v1734_v47  ;;  %v440_v47 = vld [vmem:[%s2417_s2 + $0x48] sm:$0xff] }
  0x53   :  { %1739 = vmatprep.subr.bf16.mxu0 %v1738_v51  ;;  %v1803_v48 = vpack.c.bf16 %v440_v47, %v439_v46  ;;  %v676_v47 = vld [vmem:[#allocation5 + $0xa0] sm:$0xff] }
  0x54   :  { %1801 = vmatpush3.bf16.msra.mxu1 %v1800_v45  ;;  %v1818_v45 = vpack.c.bf16 %v675_v43, %v674_v42 }
  0x55   :  { %1802 = vmatprep.subr.bf16.mxu1 %v2038_v0 }
  0x56   :  { %1741 = vmatpush3.bf16.msra.mxu0 %v1738_v51  ;;  %v1806_v51 = vpack.c.bf16 %v442_v50, %v441_v49  ;;  %v678_v50 = vld [vmem:[#allocation5 + $0xb0] sm:$0xff] }
  0x57   :  { %1743 = vmatprep.subr.bf16.mxu0 %v1742_v54 }
  0x58   :  { %1804 = vmatpush3.bf16.msra.mxu1 %v1803_v48  ;;  %v677_v48 = vld [vmem:[#allocation5 + $0xa8] sm:$0xff] }
  0x59   :  { %1805 = vmatprep.subr.bf16.mxu1 %v2038_v0  ;;  %v1822_v49 = vpack.c.bf16 %v677_v48, %v676_v47 }
  0x5a   :  { %1745 = vmatpush3.bf16.msra.mxu0 %v1742_v54  ;;  %v1809_v54 = vpack.c.bf16 %v444_v53, %v443_v52  ;;  %v680_v53 = vld [vmem:[#allocation5 + $0xc0] sm:$0xff] }
  0x5b   :  { %1747 = vmatprep.subr.bf16.mxu0 %v1746_v57 }
  0x5c   :  { %1807 = vmatpush3.bf16.msra.mxu1 %v1806_v51  ;;  %v679_v51 = vld [vmem:[#allocation5 + $0xb8] sm:$0xff] }
  0x5d   :  { %1808 = vmatprep.subr.bf16.mxu1 %v2038_v0  ;;  %v1826_v52 = vpack.c.bf16 %v679_v51, %v678_v50 }
  0x5e   :  { %1749 = vmatpush3.bf16.msra.mxu0 %v1746_v57  ;;  %v2040_v57 = vmov 0.0  }
  0x5f   :  { %1751 = vmatprep.subr.bf16.mxu0 %v1750_v60  ;;  %1532 = vmatprep.mubr.msk.f32.mxu1 %vm2039_vm4, %v2040_v57 }
  0x60   :  { %1810 = vmatpush3.bf16.msra.mxu1 %v1809_v54  ;;  %v681_v54 = vld [vmem:[#allocation5 + $0xc8] sm:$0xff] }
  0x61   :  { %1811 = vmatprep.subr.bf16.mxu1 %v2038_v0  ;;  %v1830_v55 = vpack.c.bf16 %v681_v54, %v680_v53  ;;  %v662_v53 = vld [vmem:[#allocation5 + $0x38] sm:$0xff] }
  0x62   :  { %1753 = vmatpush3.bf16.msra.mxu0 %v1750_v60 }
  0x63   :  { %1755 = vmatprep.subr.bf16.mxu0 %v1754_v63 }
  0x64   :  { %1813 = vmatpush3.bf16.msra.mxu1 %v1812_v58  ;;  %v683_v58 = vld [vmem:[#allocation5 + $0xd8] sm:$0xff] }
  0x65   :  { %1535 = vmatprep.subr.mxu1 %v2040_v57 }
  0x66   :  { %1757 = vmatpush3.bf16.msra.mxu0 %v1754_v63 }
  0x67   :  { %1759 = vmatprep.subr.bf16.mxu0 %v1758_v5 }
  0x69   :  { %1457 = vmatmul.mubr.f32.vlgmr.msra.gmra.mrb[0].mxu0 %v79_v8 }
  0x6a   :  { %1761 = vmatpush3.bf16.msra.mxu0 %v1758_v5  ;;  %1459 = vmatprep.mubr.msk.f32.mxu0 %vm1226_vm1, %v78_v13 }
  0x6b   :  { %1763 = vmatprep.subr.bf16.mxu0 %v1762_v12 }
  0x6d   :  { %1460 = vmatmul.mubr.f32.gmra.mrb[2].mxu0 %v77_v16 }
  0x6e   :  { %1765 = vmatpush3.bf16.msra.mxu0 %v1762_v12  ;;  %1494 = vmatprep.mubr.f32.mxu0 %v92_v17 }
  0x6f   :  { %1767 = vmatprep.subr.bf16.mxu0 %v1766_v10 }
  0x72   :  { %1769 = vmatpush3.bf16.msra.mxu0 %v1766_v10 }
  0x73   :  { %1771 = vmatprep.subr.bf16.mxu0 %v1770_v20 }
  0x76   :  { %1773 = vmatpush3.bf16.msra.mxu0 %v1770_v20 }
  0x77   :  { %1775 = vmatprep.subr.bf16.mxu0 %v1774_v23 }
  0x7a   :  { %1777 = vmatpush3.bf16.msra.mxu0 %v1774_v23  ;;  %v536_v23 = vld [vmem:[%s2418_s3] sm:$0xff] }
  0x7b   :  { %1779 = vmatprep.subr.bf16.mxu0 %v1778_v26 }
  0x7e   :  { %1781 = vmatpush3.bf16.msra.mxu0 %v1778_v26  ;;  %v1814_v26 = vpack.c.bf16 %v673_v25, %v672_v24 }
  0x7f   :  { %1783 = vmatprep.subr.bf16.mxu0 %v1782_v29 }
  0x82   :  { %1785 = vmatpush3.bf16.msra.mxu0 %v1782_v29 }
  0x83   :  { %1787 = vmatprep.subr.bf16.mxu0 %v1786_v32 }
  0x86   :  { %1789 = vmatpush3.bf16.msra.mxu0 %v1786_v32 }
  0x87   :  { %1910 = vmatprep.subr.bf16.mxu0 %v2038_v0 }
  0x89   :  { %1495 = vmatmul.mubr.msk.f32.vlgmr.msra.gmra.mrb[0].mxu0 %vm1227_vm3, %v91_v36 }
  0x8a   :  { %1497 = vmatprep.mubr.f32.mxu0 %v90_v37 }
  0x8d   :  { %1498 = vmatmul.mubr.msk.f32.gmra.mrb[2].mxu0 %vm1227_vm3, %v93_v40  ;;  %v529_v40 = vld [vmem:[%s2419_s4 + $0x1] sm:$0x1] }
  0x8e   :  { %1686 = vmatprep.mubr.msk.f32.mxu0 %vm2039_vm4, %v2040_v57 }
 0x15c   :  { %v2249_v59 = vpop.f32.mrb[0].mxu0 }
 0x15d   :  { %v417_v60 = vmul.f32 %v2249_v59, %v2249_v59  ;;  %v2253_v61 = vpop.f32.mrb[1].mxu0 }
 0x15e   :  { %v407_v62 = vadd.f32 %v2249_v59, %v2253_v61  ;;  %v416_v63 = vmul.f32 %v2253_v61, %v2253_v61 }
 0x160   :  { %v420_v1 = vadd.f32 %v417_v60, %v416_v63  ;;  %v2259_v2 = vpop.f32.mrb[2].mxu0  ;;  %v1834_v60 = vpack.c.bf16 %v683_v58, %v682_v56  ;;  %v685_v63 = vld [vmem:[#allocation5 + $0xe8] sm:$0xff]  ;;  %v663_v58 = vld [vmem:[#allocation5 + $0x40] sm:$0xff] }
 0x161   :  { %v2261_v3 = vpop.f32.mrb[3].mxu0  ;;  %v419_v6 = vmul.f32 %v2259_v2, %v2259_v2 }
 0x162   :  { %v408_v4 = vadd.f32 %v407_v62, %v2261_v3  ;;  %v418_v5 = vmul.f32 %v2261_v3, %v2261_v3  ;;  %v684_v62 = vld [vmem:[#allocation5 + $0xe0] sm:$0xff] }
 0x164   :  { %v409_v7 = vadd.f32 %v2259_v2, %v408_v4  ;;  %v421_v8 = vadd.f32 %v420_v1, %v418_v5  ;;  %v1838_v1 = vpack.c.bf16 %v685_v63, %v684_v62  ;;  %v686_v4 = vld [vmem:[#allocation5 + $0xf0] sm:$0xff]  ;;  %v687_v5 = vld [vmem:[#allocation5 + $0xf8] sm:$0xff] }
 0x165   :  { %v665_v63 = vld [vmem:[#allocation5 + $0x50] sm:$0xff] }
 0x166   :  { %v410_v9 = vrot.slane %v409_v7, 4  ;;  %v422_v11 = vadd.f32 %v421_v8, %v419_v6  ;;  %v1842_v6 = vpack.c.bf16 %v687_v5, %v686_v4  ;;  %v656_v8 = vld [vmem:[#allocation5 + $0x8] sm:$0xff]  ;;  %v667_v5 = vld [vmem:[#allocation5 + $0x60] sm:$0xff] }
 0x168   :  { %v411_v12 = vadd.f32 %v410_v9, %v409_v7  ;;  %v423_v13 = vrot.slane %v422_v11, 4  ;;  %v655_v7 = vld [vmem:[#allocation5] sm:$0xff] }
 0x169   :  { %v1846_v9 = vpack.c.bf16 %v656_v8, %v655_v7  ;;  %v669_v8 = vld [vmem:[#allocation5 + $0x70] sm:$0xff] }
 0x16a   :  { %v412_v14 = vrot.slane %v411_v12, 2  ;;  %v424_v15 = vadd.f32 %v423_v13, %v422_v11  ;;  %v987_v11 = vld [vmem:[%s2421_s6] sm:$0xff]  ;;  %v989_v13 = vld [vmem:[%s2421_s6 + $0x10] sm:$0xff] }
 0x16c   :  { %v413_v16 = vadd.f32 %v412_v14, %v411_v12  ;;  %v425_v10 = vrot.slane %v424_v15, 2  ;;  %v988_v12 = vld [vmem:[%s2421_s6 + $0x8] sm:$0xff] }
 0x16d   :  { %v1911_v14 = vpack.c.bf16 %v988_v12, %v987_v11  ;;  %v859_v12 = vld [vmem:[#allocation5 + $0x100] sm:$0xff] }
 0x16e   :  { %v414_v17 = vrot.slane %v413_v16, 1  ;;  %v426_v18 = vadd.f32 %v425_v10, %v424_v15  ;;  %v990_v15 = vld [vmem:[%s2421_s6 + $0x18] sm:$0xff]  ;;  %v613_v10 = vsub.s32 0, %v2148_v39 }
 0x16f   :  { %1912 = vmatpush3.bf16.msra.mxu0 %v1911_v14 }
 0x170   :  { %v427_v19 = vrot.slane %v426_v18, 1  ;;  %v415_v20 = vadd.f32 %v414_v17, %v413_v16  ;;  %v1914_v16 = vpack.c.bf16 %v990_v15, %v989_v13  ;;  %1913 = vmatprep.subr.bf16.mxu0 %v2038_v0  ;;  %v621_v17 = vsub.s32 1, %v2148_v39  ;;  %v860_v13 = vld [vmem:[#allocation5 + $0x108] sm:$0xff]  ;;  %v861_v15 = vld [vmem:[#allocation5 + $0x110] sm:$0xff] }
 0x171   :  { %v1878_v14 = vpack.c.bf16 %v860_v13, %v859_v12 }
 0x172   :  { %v428_v21 = vadd.f32 %v427_v19, %v426_v18 }
 0x173   :  { %1915 = vmatpush3.bf16.msra.mxu0 %v1914_v16  ;;  %v862_v16 = vld [vmem:[#allocation5 + $0x118] sm:$0xff] }
 0x174   :  { %v430_v22 = vsel %vm429_vm5, %v415_v20, %v428_v21  ;;  %1916 = vmatprep.subr.bf16.mxu0 %v2038_v0 }
 0x175   :  { %1533 = vmatmul.mubr.f32.vlgmr.msra.gmra.mrb[0].mxu1 %v430_v22 }
 0x176   :  { %1537 = vmatprep.mubr.msk.f32.mxu1 %vm2039_vm4, %v2040_v57  ;;  %1536 = vmatpush3.msra.mxu1 %v536_v23 }
 0x177   :  { %1815 = vmatprep.subr.bf16.mxu1 %v1814_v26 }
 0x248   :  { %v513_v27 = vpop.f32.mrb[0].mxu1 }
 0x249   :  { %v517_v28 = vmul.f32 %v513_v27, %v513_v27  ;;  %v1534_v29 = vpop.f32.mrb[1].mxu1 }
 0x24a   :  { %v657_v29 = vld [vmem:[#allocation5 + $0x10] sm:$0xff] }
 0x24b   :  { %v519_v30 = vrot.slane %v517_v28, 7 }
 0x24d   :  { %v521_v31 = vsub.f32 %v513_v27, %v519_v30  ;;  %v658_v30 = vld [vmem:[#allocation5 + $0x18] sm:$0xff] }
 0x24f   :  { %v523_v32 = vadd.f32 1e-05, %v521_v31 }
 0x251   :  { %1958 = vrsqrt.f32 %v523_v32 }
 0x25b   :  { %v1959_v33 = vpop.eup %1958 }
 0x25c   :  { %v526_v36 = vrot.slane %v1959_v33, 1 }
 0x25e   :  { %v528_v37 = vmul.f32 %v526_v36, %v522_v35 }
 0x260   :  { %v530_v38 = vmul.f32 %v528_v37, %v513_v27 }
 0x262   :  { %v531_v41 = vsub.f32 %v529_v40, %v530_v38  ;;  %v659_v40 = vld [vmem:[#allocation5 + $0x20] sm:$0xff]  ;;  %v660_v38 = vld [vmem:[#allocation5 + $0x28] sm:$0xff] }
 0x264   :  { %v533_v44 = vrot.slane %v531_v41, 7 }
 0x266   :  { %v535_v46 = vsel %vm429_vm5, %v528_v37, %v533_v44  ;;  %v1850_v37 = vpack.c.bf16 %v658_v30, %v657_v29  ;;  %v870_v29 = vld [vmem:[#allocation5 + $0x158] sm:$0xff] }
 0x267   :  { %1538 = vmatmul.mubr.msk.f32.vlgmr.msra.gmra.mrb[2].mxu1 %vm537_vm6, %v535_v46  ;;  %v1854_v46 = vpack.c.bf16 %v660_v38, %v659_v40  ;;  %v991_v40 = vld [vmem:[%s2421_s6 + $0x20] sm:$0xff]  ;;  %v992_v38 = vld [vmem:[%s2421_s6 + $0x28] sm:$0xff] }
 0x268   :  { %1817 = vmatpush3.bf16.msra.mxu1 %v1814_v26 }
 0x269   :  { %1819 = vmatprep.subr.bf16.mxu1 %v1818_v45 }
 0x26c   :  { %1821 = vmatpush3.bf16.msra.mxu1 %v1818_v45 }
 0x26d   :  { %1823 = vmatprep.subr.bf16.mxu1 %v1822_v49 }
 0x270   :  { %1825 = vmatpush3.bf16.msra.mxu1 %v1822_v49 }
 0x271   :  { %1827 = vmatprep.subr.bf16.mxu1 %v1826_v52 }
 0x274   :  { %1829 = vmatpush3.bf16.msra.mxu1 %v1826_v52  ;;  %v661_v52 = vld [vmem:[#allocation5 + $0x30] sm:$0xff] }
 0x275   :  { %1831 = vmatprep.subr.bf16.mxu1 %v1830_v55  ;;  %v1858_v56 = vpack.c.bf16 %v662_v53, %v661_v52 }
 0x278   :  { %1833 = vmatpush3.bf16.msra.mxu1 %v1830_v55 }
 0x279   :  { %1835 = vmatprep.subr.bf16.mxu1 %v1834_v60 }
 0x27c   :  { %1837 = vmatpush3.bf16.msra.mxu1 %v1834_v60  ;;  %v664_v60 = vld [vmem:[#allocation5 + $0x48] sm:$0xff] }
 0x27d   :  { %1839 = vmatprep.subr.bf16.mxu1 %v1838_v1  ;;  %v1862_v62 = vpack.c.bf16 %v664_v60, %v663_v58 }
 0x280   :  { %1841 = vmatpush3.bf16.msra.mxu1 %v1838_v1  ;;  %v666_v1 = vld [vmem:[#allocation5 + $0x58] sm:$0xff] }
 0x281   :  { %1843 = vmatprep.subr.bf16.mxu1 %v1842_v6  ;;  %v1866_v4 = vpack.c.bf16 %v666_v1, %v665_v63 }
 0x284   :  { %1845 = vmatpush3.bf16.msra.mxu1 %v1842_v6  ;;  %v668_v6 = vld [vmem:[#allocation5 + $0x68] sm:$0xff] }
 0x285   :  { %1847 = vmatprep.subr.bf16.mxu1 %v1846_v9  ;;  %v1870_v7 = vpack.c.bf16 %v668_v6, %v667_v5 }
 0x33a   :  { %v607_v18 = vpop.f32.mrb[2].mxu1 }
 0x33b   :  { %v614_v19 = vrot.slane %v607_v18, %v613_v10  ;;  %v1539_v20 = vpop.f32.mrb[3].mxu1  ;;  %v622_v21 = vrot.slane %v607_v18, %v621_v17  ;;  %v1882_v18 = vpack.c.bf16 %v862_v16, %v861_v15 }
 0x33c   :  { %v864_v20 = vld [vmem:[#allocation5 + $0x128] sm:$0xff] }
 0x33d   :  { %v616_v22 = vmul.f32 %v2249_v59, %v614_v19  ;;  %v615_v23 = vmul.f32 %v614_v19, %v2253_v61  ;;  %v617_v24 = vmul.f32 %v614_v19, %v2261_v3  ;;  %v618_v25 = vmul.f32 %v2259_v2, %v614_v19  ;;  %v863_v19 = vld [vmem:[#allocation5 + $0x120] sm:$0xff] }
 0x33f   :  { %v623_v26 = vadd.f32 %v622_v21, %v615_v23  ;;  %v624_v27 = vadd.f32 %v622_v21, %v616_v22  ;;  %v625_v28 = vadd.f32 %v622_v21, %v617_v24  ;;  %v626_v31 = vadd.f32 %v622_v21, %v618_v25  ;;  %v865_v22 = vld [vmem:[#allocation5 + $0x130] sm:$0xff]  ;;  %v866_v23 = vld [vmem:[#allocation5 + $0x138] sm:$0xff]  ;;  %v867_v25 = vld [vmem:[#allocation5 + $0x140] sm:$0xff] }
 0x340   :  { %v1886_v21 = vpack.c.bf16 %v864_v20, %v863_v19  ;;  %v1890_v24 = vpack.c.bf16 %v866_v23, %v865_v22  ;;  %v1092_v22 = vld [vmem:[%s2422_s7] sm:$0xff]  ;;  %s2041_s7 = smov [#allocation7]  }
 0x341   :  { %v627_v32 = vmax.f32 %v623_v26, 0.0  ;;  %v628_v33 = vmax.f32 %v624_v27, 0.0  ;;  %v629_v35 = vmax.f32 %v625_v28, 0.0  ;;  %v630_v36 = vmax.f32 %v626_v31, 0.0  ;;  %v868_v26 = vld [vmem:[#allocation5 + $0x148] sm:$0xff]  ;;  %v869_v28 = vld [vmem:[#allocation5 + $0x150] sm:$0xff] }
 0x342   :  { %v1894_v27 = vpack.c.bf16 %v868_v26, %v867_v25  ;;  %v1898_v30 = vpack.c.bf16 %v870_v29, %v869_v28  ;;  %v871_v31 = vld [vmem:[#allocation5 + $0x160] sm:$0xff] }
 0x343   :  { %1572 = vmatprep.mubr.f32.mxu1 %v627_v32  ;;  %v645_v59 = vrot.slane %v629_v35, 1  ;;  %v631_v61 = vrot.slane %v627_v32, 7  ;;  %v634_v41 = vrot.slane %v630_v36, 7  ;;  %v632_v3 = vrot.slane %v628_v33, 7 }
 0x344   :  { %1573 = vmatmul.mubr.f32.vlgmr.msra.gmra.mrb[4].mxu1 %v628_v33  ;;  %v633_v2 = vrot.slane %v629_v35, 7  ;;  %v643_v42 = vrot.slane %v627_v32, 1  ;;  %v644_v43 = vrot.slane %v628_v33, 1  ;;  %v646_v44 = vrot.slane %v630_v36, 1  ;;  %v872_v32 = vld [vmem:[#allocation5 + $0x168] sm:$0xff] }
 0x345   :  { %1849 = vmatpush3.bf16.msra.mxu1 %v1846_v9  ;;  %1575 = vmatprep.mubr.f32.mxu1 %v629_v35  ;;  %v638_v45 = vsel %vm76_vm0, %v634_v41, %v631_v61  ;;  %v637_v47 = vsel %vm76_vm0, %v631_v61, %v632_v3  ;;  %v670_v9 = vld [vmem:[#allocation5 + $0x78] sm:$0xff]  ;;  %v1902_v33 = vpack.c.bf16 %v872_v32, %v871_v31  ;;  %v873_v35 = vld [vmem:[#allocation5 + $0x170] sm:$0xff] }
 0x346   :  { %1851 = vmatprep.subr.bf16.mxu1 %v1850_v37  ;;  %v636_v48 = vsel %vm76_vm0, %v632_v3, %v633_v2  ;;  %v635_v49 = vsel %vm76_vm0, %v633_v2, %v634_v41  ;;  %v649_v50 = vsel %vm89_vm2, %v643_v42, %v644_v43  ;;  %v2319_v51 = vsel %vm89_vm2, %v644_v43, %v645_v59  ;;  %v993_v61 = vld [vmem:[%s2421_s6 + $0x30] sm:$0xff]  ;;  %v995_v3 = vld [vmem:[%s2421_s6 + $0x40] sm:$0xff]  ;;  %v996_v2 = vld [vmem:[%s2421_s6 + $0x48] sm:$0xff] }
 0x347   :  { %v2323_v54 = vsel %vm89_vm2, %v645_v59, %v646_v44  ;;  %v2327_v55 = vsel %vm89_vm2, %v646_v44, %v643_v42  ;;  %v1874_v11 = vpack.c.bf16 %v670_v9, %v669_v8  ;;  %v1917_v59 = vpack.c.bf16 %v992_v38, %v991_v40  ;;  %v997_v43 = vld [vmem:[%s2421_s6 + $0x50] sm:$0xff]  ;;  %v998_v44 = vld [vmem:[%s2421_s6 + $0x58] sm:$0xff] }
 0x348   :  { %1576 = vmatmul.mubr.f32.gmra.mrb[6].mxu1 %v630_v36  ;;  %v874_v36 = vld [vmem:[#allocation5 + $0x178] sm:$0xff]  ;;  %v1920_v41 = vpack.c.bf16 %v994_v34, %v993_v61  ;;  %v1923_v42 = vpack.c.bf16 %v996_v2, %v995_v3 }
 0x349   :  { %1853 = vmatpush3.bf16.msra.mxu1 %v1850_v37  ;;  %1610 = vmatprep.mubr.msk.f32.mxu1 %vm1226_vm1, %v638_v45  ;;  %v1906_v37 = vpack.c.bf16 %v874_v36, %v873_v35  ;;  %v1926_v45 = vpack.c.bf16 %v998_v44, %v997_v43 }
 0x34a   :  { %1855 = vmatprep.subr.bf16.mxu1 %v1854_v46  ;;  %1918 = vmatpush3.bf16.msra.mxu0 %v1917_v59 }
 0x34b   :  { %1919 = vmatprep.subr.bf16.mxu0 %v2038_v0 }
 0x34d   :  { %1857 = vmatpush3.bf16.msra.mxu1 %v1854_v46  ;;  %v999_v46 = vld [vmem:[%s2421_s6 + $0x60] sm:$0xff] }
 0x34e   :  { %1859 = vmatprep.subr.bf16.mxu1 %v1858_v56  ;;  %1921 = vmatpush3.bf16.msra.mxu0 %v1920_v41 }
 0x34f   :  { %1922 = vmatprep.subr.bf16.mxu0 %v2038_v0 }
 0x351   :  { %1861 = vmatpush3.bf16.msra.mxu1 %v1858_v56 }
 0x352   :  { %1863 = vmatprep.subr.bf16.mxu1 %v1862_v62  ;;  %1924 = vmatpush3.bf16.msra.mxu0 %v1923_v42 }
 0x353   :  { %1925 = vmatprep.subr.bf16.mxu0 %v2038_v0 }
 0x355   :  { %1865 = vmatpush3.bf16.msra.mxu1 %v1862_v62 }
 0x356   :  { %1867 = vmatprep.subr.bf16.mxu1 %v1866_v4  ;;  %1927 = vmatpush3.bf16.msra.mxu0 %v1926_v45 }
 0x357   :  { %1928 = vmatprep.subr.bf16.mxu0 %v2038_v0 }
 0x359   :  { %1869 = vmatpush3.bf16.msra.mxu1 %v1866_v4 }
 0x35a   :  { %1871 = vmatprep.subr.bf16.mxu1 %v1870_v7 }
 0x35d   :  { %1873 = vmatpush3.bf16.msra.mxu1 %v1870_v7 }
 0x35e   :  { %1875 = vmatprep.subr.bf16.mxu1 %v1874_v11 }
 0x361   :  { %1877 = vmatpush3.bf16.msra.mxu1 %v1874_v11 }
 0x362   :  { %1879 = vmatprep.subr.bf16.mxu1 %v1878_v14 }
 0x364   :  { %1611 = vmatmul.mubr.f32.vlgmr.msra.gmra.mrb[4].mxu1 %v637_v47  ;;  %v1000_v47 = vld [vmem:[%s2421_s6 + $0x68] sm:$0xff] }
 0x365   :  { %1613 = vmatprep.mubr.msk.f32.mxu1 %vm1226_vm1, %v636_v48  ;;  %1881 = vmatpush3.bf16.msra.mxu1 %v1878_v14  ;;  %v1929_v48 = vpack.c.bf16 %v1000_v47, %v999_v46 }
 0x366   :  { %1883 = vmatprep.subr.bf16.mxu1 %v1882_v18 }
 0x367   :  { %1930 = vmatpush3.bf16.msra.mxu0 %v1929_v48 }
 0x368   :  { %1614 = vmatmul.mubr.f32.gmra.mrb[6].mxu1 %v635_v49  ;;  %1931 = vmatprep.subr.bf16.mxu0 %v2038_v0  ;;  %v1001_v49 = vld [vmem:[%s2421_s6 + $0x70] sm:$0xff] }
 0x369   :  { %1885 = vmatpush3.bf16.msra.mxu1 %v1882_v18  ;;  %1648 = vmatprep.mubr.f32.mxu1 %v649_v50  ;;  %v1002_v50 = vld [vmem:[%s2421_s6 + $0x78] sm:$0xff] }
 0x36a   :  { %1887 = vmatprep.subr.bf16.mxu1 %v1886_v21 }
 0x36d   :  { %1889 = vmatpush3.bf16.msra.mxu1 %v1886_v21 }
 0x36e   :  { %1891 = vmatprep.subr.bf16.mxu1 %v1890_v24 }
 0x371   :  { %1893 = vmatpush3.bf16.msra.mxu1 %v1890_v24 }
 0x372   :  { %1895 = vmatprep.subr.bf16.mxu1 %v1894_v27 }
 0x375   :  { %1897 = vmatpush3.bf16.msra.mxu1 %v1894_v27 }
 0x376   :  { %1899 = vmatprep.subr.bf16.mxu1 %v1898_v30 }
 0x379   :  { %1901 = vmatpush3.bf16.msra.mxu1 %v1898_v30  ;;  %v1078_v30 = vld [vmem:[%s2423_s8] sm:$0x1] }
 0x37a   :  { %1903 = vmatprep.subr.bf16.mxu1 %v1902_v33 }
 0x37d   :  { %1905 = vmatpush3.bf16.msra.mxu1 %v1902_v33 }
 0x37e   :  { %1907 = vmatprep.subr.bf16.mxu1 %v1906_v37 }
 0x381   :  { %1909 = vmatpush3.bf16.msra.mxu1 %v1906_v37 }
 0x384   :  { %1649 = vmatmul.mubr.msk.f32.vlgmr.msra.gmra.mrb[4].mxu1 %vm1227_vm3, %v2319_v51  ;;  %v1932_v51 = vpack.c.bf16 %v1002_v50, %v1001_v49 }
 0x385   :  { %1651 = vmatprep.mubr.f32.mxu1 %v2323_v54 }
 0x386   :  { %1933 = vmatpush3.bf16.msra.mxu0 %v1932_v51 }
 0x387   :  { %1689 = vmatprep.subr.mxu0 %v2040_v57 }
 0x388   :  { %1652 = vmatmul.mubr.msk.f32.gmra.mrb[6].mxu1 %vm1227_vm3, %v2327_v55 }
 0x457   :  { %v1650_v52 = vpop.f32.mrb[4].mxu1 }
 0x458   :  { %v974_v53 = vmul.f32 %v1650_v52, %v1650_v52  ;;  %v941_v54 = vpop.f32.mrb[5].mxu1 }
 0x459   :  { %v964_v55 = vadd.f32 %v1650_v52, %v941_v54  ;;  %v973_v56 = vmul.f32 %v941_v54, %v941_v54 }
 0x45b   :  { %v977_v58 = vadd.f32 %v974_v53, %v973_v56  ;;  %v1653_v60 = vpop.f32.mrb[6].mxu1 }
 0x45c   :  { %v951_v0 = vpop.f32.mrb[7].mxu1  ;;  %v976_v1 = vmul.f32 %v1653_v60, %v1653_v60 }
 0x45d   :  { %v965_v62 = vadd.f32 %v964_v55, %v951_v0  ;;  %v975_v63 = vmul.f32 %v951_v0, %v951_v0 }
 0x45f   :  { %v966_v4 = vadd.f32 %v1653_v60, %v965_v62  ;;  %v978_v5 = vadd.f32 %v977_v58, %v975_v63 }
 0x461   :  { %v967_v6 = vrot.slane %v966_v4, 4  ;;  %v979_v7 = vadd.f32 %v978_v5, %v976_v1 }
 0x463   :  { %v968_v8 = vadd.f32 %v967_v6, %v966_v4  ;;  %v980_v9 = vrot.slane %v979_v7, 4 }
 0x465   :  { %v969_v11 = vrot.slane %v968_v8, 2  ;;  %v981_v12 = vadd.f32 %v980_v9, %v979_v7 }
 0x467   :  { %v970_v13 = vadd.f32 %v969_v11, %v968_v8  ;;  %v982_v14 = vrot.slane %v981_v12, 2 }
 0x469   :  { %v971_v15 = vrot.slane %v970_v13, 1  ;;  %v983_v16 = vadd.f32 %v982_v14, %v981_v12 }
 0x46b   :  { %v984_v18 = vrot.slane %v983_v16, 1  ;;  %v972_v19 = vadd.f32 %v971_v15, %v970_v13 }
 0x46d   :  { %v985_v20 = vadd.f32 %v984_v18, %v983_v16 }
 0x46f   :  { %v986_v21 = vsel %vm429_vm5, %v972_v19, %v985_v20 }
 0x470   :  { %1687 = vmatmul.mubr.f32.vlgmr.msra.gmra.mrb[4].mxu0 %v986_v21 }
 0x471   :  { %1691 = vmatprep.mubr.msk.f32.mxu0 %vm2039_vm4, %v2040_v57  ;;  %1690 = vmatpush3.msra.mxu0 %v1092_v22  ;;  %v1085_v57 = vld [vmem:[%s2423_s8 + $0x1] sm:$0x1]  ;;  %s1195_s8 = sshll.u32 %s2041_s7, 4  ;;  %s1196_s8 = int_to_ptr.vmem [resolvable:$true] %s1195_s8 }
 0x472   :  { %s2006_s25 = scalar_lea.vmem %s1196_s8, 512  ;;  %p2011_p3 = scmp.lt.s32.totalorder %s1196_s8, %s1196_s8 }
 0x473   :  { %p2007_p2 = scmp.ne.s32.totalorder %s1196_s8, %s2006_s25  ;;  %p2012_p4 = scmp.lt.s32.totalorder %s2006_s25, %s2006_s25 }
 0x475   :  { %p2013_p5 = por %p2012_p4, %p2011_p3 }
 0x477   :  { %p2014_p6 = pnand %p2013_p5, %p2007_p2 }
 0x543   :  { %v1069_v23 = vpop.f32.mrb[4].mxu0 }
 0x544   :  { %v1073_v24 = vmul.f32 %v1069_v23, %v1069_v23  ;;  %v1688_v25 = vpop.f32.mrb[5].mxu0 }
 0x546   :  { %v1075_v26 = vrot.slane %v1073_v24, 7 }
 0x548   :  { %v1077_v27 = vsub.f32 %v1069_v23, %v1075_v26 }
 0x54a   :  { %v1079_v28 = vadd.f32 1e-05, %v1077_v27 }
 0x54c   :  { %1960 = vrsqrt.f32 %v1079_v28 }
 0x556   :  { %v1961_v29 = vpop.eup %1960 }
 0x557   :  { %v1082_v31 = vrot.slane %v1961_v29, 1 }
 0x559   :  { %v1084_v32 = vmul.f32 %v1082_v31, %v1078_v30 }
 0x55b   :  { %v1086_v33 = vmul.f32 %v1084_v32, %v1069_v23 }
 0x55d   :  { %v1087_v35 = vsub.f32 %v1085_v57, %v1086_v33 }
 0x55f   :  { %v1089_v36 = vrot.slane %v1087_v35, 7 }
 0x561   :  { %v1091_v37 = vsel %vm429_vm5, %v1084_v32, %v1089_v36 }
 0x562   :  { %1692 = vmatmul.mubr.msk.f32.vlgmr.msra.gmra.mrb[6].mxu0 %vm537_vm6, %v1091_v37 }
 0x635   :  { %v1162_v40 = vpop.f32.mrb[6].mxu0 }
 0x636   :  { %v1169_v38 = vrot.slane %v1162_v40, %v613_v10  ;;  %v1693_v59 = vpop.f32.mrb[7].mxu0  ;;  %v1177_v61 = vrot.slane %v1162_v40, %v621_v17 }
 0x638   :  { %v1170_v34 = vmul.f32 %v1169_v38, %v941_v54  ;;  %v1171_v41 = vmul.f32 %v1650_v52, %v1169_v38  ;;  %v1172_v3 = vmul.f32 %v1169_v38, %v951_v0  ;;  %v1173_v2 = vmul.f32 %v1653_v60, %v1169_v38 }
 0x63a   :  { %v1178_v42 = vadd.f32 %v1177_v61, %v1170_v34  ;;  %v1179_v43 = vadd.f32 %v1177_v61, %v1171_v41  ;;  %v1180_v44 = vadd.f32 %v1177_v61, %v1172_v3  ;;  %v1181_v45 = vadd.f32 %v1177_v61, %v1173_v2 }
 0x63c   :  { %v1182_v46 = vmax.f32 %v1178_v42, 0.0  ;;  %v1183_v47 = vmax.f32 %v1179_v43, 0.0  ;;  %v1184_v48 = vmax.f32 %v1180_v44, 0.0  ;;  %v1185_v49 = vmax.f32 %v1181_v45, 0.0 }
 0x63e   :  { %1186 = vst [vmem:[#allocation7] sm:$0xff] %v1182_v46  ;;  %1187 = vst [vmem:[#allocation7 + $0x8] sm:$0xff] %v1183_v47 }
 0x63f   :  { %1188 = vst [vmem:[#allocation7 + $0x10] sm:$0xff] %v1184_v48  ;;  %1189 = vst [vmem:[#allocation7 + $0x18] sm:$0xff] %v1185_v49 }
 0x640   :  { %2017 = shalt.err (!%p2014_p6)
}
 0x641   :  { %s2018_s28 = scalar_lea.hbm %s2424_s9, 512 }
 0x642   :  { %p2019_p7 = scmp.ne.s32.totalorder %s2424_s9, %s2018_s28  ;;  %p2022_p8 = scmp.lt.u32.totalorder %s2018_s28, %s2424_s9 }
 0x644   :  { %p2024_p9 = pnand %p2022_p8, %p2019_p7 }
 0x646   :  { %2027 = shalt.err (!%p2024_p9)
}
 0x647   :  { %1201 = dma.vmem_to_hbm [thread:$0]  %s1196_s8, 512, %s2424_s9, [#allocation4], %s2035_s19, %s2035_s19, %s2036_s20  }
 0x648   :  { %2032 = dma.done.wait [#allocation4], 512  }
 0x649   :  { %2033 = vsyncadd [#allocation4], 4294966784 }
 0x64a   :  { %1205 = vsyncpa [#allocation3], 1 }
 0x64b   :  { %1206 = vsyncpa [#allocation6], 1 }
 0x64c   :  { %1207 = vsyncpa [#allocation4], 1 }

</bundles_post_ra>
